<compile_context>
chip_gen: v7x
topology: tpu7x:2x2x1
jax: 0.10.0
libtpu: 0.0.40
codegen_flags: <defaults>
</compile_context>

<pallas_src>
import functools
import math

import numpy as np
import jax
import jax.numpy as jnp
from jax import lax
from jax.experimental import pallas as pl
from jax.experimental.pallas import tpu as pltpu

STEP_SIZE = 0.05          # torchdiffeq options={'step_size': 0.05}
DRIFT_HIDDEN = 64         # ODEGRUDrift: Linear(H, 64) -> tanh -> Linear(64, H)


# ----------------------------------------------------------------------------------
# Host-side replica of torchdiffeq's fixed-grid constructor for method='rk4'.
# Returns the signed per-substep dt values for interval [t0, t1] (negative when
# integrating backwards in time; the drift is autonomous, so a reversed-time RK4 step
# is exactly an RK4 step with negative dt).
# ----------------------------------------------------------------------------------
def _interval_substep_dts(t0, t1, step_size=STEP_SIZE):
    t0 = float(t0)
    t1 = float(t1)
    sign = 1.0 if t1 >= t0 else -1.0
    start, end = (t0, t1) if t1 >= t0 else (-t0, -t1)
    niters = int(math.ceil((end - start) / step_size + 1.0))
    grid = np.arange(niters, dtype=np.float64) * step_size + start
    grid[-1] = end
    return (sign * np.diff(grid)).astype(np.float32)


def _rk4_schedule(t, step_size=STEP_SIZE):
    """Per-interval RK4 substep dts (zero-padded to the max count) + real counts."""
    t_np = np.asarray(t, dtype=np.float64)
    S = t_np.shape[0]
    t_rev = t_np[::-1]
    per = [_interval_substep_dts(t_rev[i], t_rev[i + 1], step_size)
           for i in range(S - 1)]
    n_sub = max(1, max(len(d) for d in per))
    dts = np.zeros((S - 1, n_sub), dtype=np.float32)
    nsub = np.zeros((S - 1,), dtype=np.int32)
    for i, d in enumerate(per):
        dts[i, :len(d)] = d
        nsub[i] = len(d)
    return dts, nsub


def _input_projection(x, params):
    """gx = x @ W_ih + b_ih, split into lane-aligned per-gate tiles [r, z, n]."""
    H = params["whh_t"].shape[0]
    gx = jnp.einsum("sbd,dg->sbg", x, params["wih_t"]) + params["bih"]
    return gx[..., 0:H], gx[..., H:2 * H], gx[..., 2 * H:3 * H]


# ----------------------------------------------------------------------------------
# Pallas kernel: the entire reversed-time recurrence in one invocation.
# ----------------------------------------------------------------------------------
def _odegru_kernel(dts_ref, nsub_ref,                        # SMEM schedules
                   gxr_ref, gxz_ref, gxn_ref,                # VMEM (S, Bp, H) f32
                   whr_ref, whz_ref, whn_ref,                # VMEM (H, H) bf16
                   bhr_ref, bhz_ref, bhn_ref,                # VMEM (1, H) f32
                   w1_ref, b1_ref, w2_ref, b2_ref,           # drift MLP params
                   out_ref,                                  # VMEM (S, Bp, H) f32
                   *, seq_len, batch_pad, hidden, n_sub_max):
    S, B, H = seq_len, batch_pad, hidden
    K1 = w1_ref.shape[-1]

    # ---- hoist all weights (bf16 MXU feed) and biases (f32) into vregs once -------
    whr = whr_ref[...]
    whz = whz_ref[...]
    whn = whn_ref[...]
    w1 = w1_ref[...]
    w2 = w2_ref[...]
    bhr = jnp.broadcast_to(bhr_ref[...], (B, H))
    bhz = jnp.broadcast_to(bhz_ref[...], (B, H))
    bhn = jnp.broadcast_to(bhn_ref[...], (B, H))
    b1b = jnp.broadcast_to(b1_ref[...], (B, K1))
    b2b = jnp.broadcast_to(b2_ref[...], (B, H))

    def drift(h):
        hb = h.astype(jnp.bfloat16)
        z1 = jnp.tanh(jnp.dot(hb, w1, preferred_element_type=jnp.float32) + b1b)
        return jnp.dot(z1.astype(jnp.bfloat16), w2,
                       preferred_element_type=jnp.float32) + b2b

    def gru(gx_r, gx_z, gx_n, h_prev):
        # PyTorch nn.GRUCell semantics; one (B,H)@(H,H) matmul per gate so each
        # gate tile starts at lane 0 (no cross-lane slicing on the serial path).
        hb = h_prev.astype(jnp.bfloat16)
        gh_r = jnp.dot(hb, whr, preferred_element_type=jnp.float32) + bhr
        gh_z = jnp.dot(hb, whz, preferred_element_type=jnp.float32) + bhz
        gh_n = jnp.dot(hb, whn, preferred_element_type=jnp.float32) + bhn
        r = jax.nn.sigmoid(gx_r + gh_r)
        z = jax.nn.sigmoid(gx_z + gh_z)
        n = jnp.tanh(gx_n + r * gh_n)
        return (1.0 - z) * n + z * h_prev

    def step_body(i, h):
        si = (S - 1) - i                          # reversed-time sequence index
        hh = gru(gxr_ref[si], gxz_ref[si], gxn_ref[si], h)

        base = i * n_sub_max

        def substep(k, hcur):
            # Fixed-step 3/8-rule RK4 (torchdiffeq "rk4") of the autonomous drift.
            dt = dts_ref[base + k]
            dt3 = dt * (1.0 / 3.0)
            dt8 = dt * 0.125
            dtb = jnp.broadcast_to(dt, (B, H))    # splat scalars once per substep
            dt3b = jnp.broadcast_to(dt3, (B, H))
            dt8b = jnp.broadcast_to(dt8, (B, H))
            k1 = drift(hcur)
            k1_3 = dt3b * k1
            k2 = drift(hcur + k1_3)
            k3 = drift(hcur + dtb * k2 - k1_3)
            k4 = drift(hcur + dtb * (k1 - k2 + k3))
            return hcur + dt8b * (k1 + 3.0 * (k2 + k3) + k4)

        # Only the real substeps for this interval (padded ones are skipped).
        hh = lax.fori_loop(0, nsub_ref[i], substep, hh)
        out_ref[si] = hh                          # single write per step
        return hh

    h0 = jnp.zeros((B, H), jnp.float32)
    h = lax.fori_loop(0, S - 1, step_body, h0)
    # Last reversed step: GRU only (no ODE evolution afterwards).
    out_ref[0] = gru(gxr_ref[0], gxz_ref[0], gxn_ref[0], h)


# ----------------------------------------------------------------------------------
# Wrapper
# ----------------------------------------------------------------------------------
def odegru_forward(x, t, params, step_size=STEP_SIZE):
    S, B, D = x.shape
    H = params["whh_t"].shape[0]
    assert S >= 2, "need at least two time stamps"

    # Host-side RK4 substep schedule (t is host-side control flow for torchdiffeq too).
    dts, nsub = _rk4_schedule(t, step_size)
    n_sub = dts.shape[1]

    # Pad batch to a sublane multiple (8): full-sublane vregs, unmasked stores; MXU
    # cost at M<=8 is identical.  Padded rows are sliced away at the end.
    Bp = max(8, ((B + 7) // 8) * 8)
    x_pad = x
    if Bp != B:
        x_pad = jnp.concatenate([x, jnp.zeros((S, Bp - B, D), x.dtype)], axis=1)

    # Input projection off the serial chain: one XLA matmul in the wrapper, split into
    # per-gate lane-aligned (S, Bp, H) tiles.
    gx_r, gx_z, gx_n = _input_projection(x_pad, params)

    # Per-gate split of W_hh (vreg-aligned gate tiles) + explicit bf16 MXU feed.
    whh = params["whh_t"]
    whr = whh[:, 0:H].astype(jnp.bfloat16)
    whz = whh[:, H:2 * H].astype(jnp.bfloat16)
    whn = whh[:, 2 * H:3 * H].astype(jnp.bfloat16)
    bhh = params["bhh"]
    bhr, bhz, bhn = bhh[:, 0:H], bhh[:, H:2 * H], bhh[:, 2 * H:3 * H]
    w1 = params["w1_t"].astype(jnp.bfloat16)
    w2 = params["w2_t"].astype(jnp.bfloat16)

    kernel = functools.partial(_odegru_kernel, seq_len=S, batch_pad=Bp,
                               hidden=H, n_sub_max=n_sub)
    smem = lambda: pl.BlockSpec(memory_space=pltpu.MemorySpace.SMEM)
    vmem = lambda: pl.BlockSpec(memory_space=pltpu.MemorySpace.VMEM)

    out = pl.pallas_call(
        kernel,
        out_shape=jax.ShapeDtypeStruct((S, Bp, H), jnp.float32),
        in_specs=[
            smem(), smem(),                       # dts (1D), per-interval counts
            vmem(), vmem(), vmem(),               # gx_r, gx_z, gx_n
            vmem(), vmem(), vmem(),               # whh per-gate (bf16)
            vmem(), vmem(), vmem(),               # bhh per-gate
            vmem(), vmem(), vmem(), vmem(),       # w1, b1, w2, b2
        ],
        out_specs=vmem(),
        compiler_params=pltpu.CompilerParams(vmem_limit_bytes=32 * 1024 * 1024),
    )(jnp.asarray(dts.reshape(-1)), jnp.asarray(nsub),
      gx_r, gx_z, gx_n,
      whr, whz, whn, bhr, bhz, bhn,
      w1, params["b1"], w2, params["b2"])

    return out[:, :B, :], dts, nsub


# ----------------------------------------------------------------------------------
# Pure-JAX reference (mirrors the PyTorch forward and the kernel's bf16-feed / f32-
# accumulate matmul convention, using the same substep schedule).
# ----------------------------------------------------------------------------------
def odegru_reference(x, dts, nsub, params):
    S, B, D = x.shape
    H = params["whh_t"].shape[0]
    p = params

    def bdot(a, w):
        return jnp.dot(a.astype(jnp.bfloat16), w.astype(jnp.bfloat16),
                       preferred_element_type=jnp.float32)

    gx_r, gx_z, gx_n = _input_projection(x, params)

    def drift(h):
        z1 = jnp.tanh(bdot(h, p["w1_t"]) + p["b1"])
        return bdot(z1, p["w2_t"]) + p["b2"]

    h = jnp.zeros((B, H), jnp.float32)
    outs = [None] * S
    for i in range(S):
        si = S - 1 - i
        gh = bdot(h, p["whh_t"]) + p["bhh"]
        r = jax.nn.sigmoid(gx_r[si] + gh[:, 0:H])
        z = jax.nn.sigmoid(gx_z[si] + gh[:, H:2 * H])
        n = jnp.tanh(gx_n[si] + r * gh[:, 2 * H:3 * H])
        h = (1.0 - z) * n + z * h
        if i < S - 1:
            for k in range(int(nsub[i])):
                dt = float(dts[i, k])
                k1 = drift(h)
                k2 = drift(h + dt * k1 / 3.0)
                k3 = drift(h + dt * (k2 - k1 / 3.0))
                k4 = drift(h + dt * (k1 - k2 + k3))
                h = h + dt * 0.125 * (k1 + 3.0 * (k2 + k3) + k4)
        outs[si] = h
    return jnp.stack(outs)


# ----------------------------------------------------------------------------------
# Deterministic parameter init (shapes from ODEGRU.__init__; values are synthetic).
# ----------------------------------------------------------------------------------
def init_params(key, input_dim, hidden_size, drift_hidden=DRIFT_HIDDEN):
    ks = jax.random.split(key, 8)
    u = lambda k, shape, b: jax.random.uniform(k, shape, jnp.float32, -b, b)
    sg = 1.0 / math.sqrt(hidden_size)
    wih = u(ks[0], (3 * hidden_size, input_dim), sg)     # GRUCell weight_ih [r;z;n]
    whh = u(ks[1], (3 * hidden_size, hidden_size), sg)   # GRUCell weight_hh
    bih = u(ks[2], (3 * hidden_size,), sg)
    bhh = u(ks[3], (3 * hidden_size,), sg)
    s1 = 1.0 / math.sqrt(hidden_size)
    w1 = u(ks[4], (drift_hidden, hidden_size), s1)       # drift Linear(H, 64)
    b1 = u(ks[5], (drift_hidden,), s1)
    s2 = 1.0 / math.sqrt(drift_hidden)
    w2 = u(ks[6], (hidden_size, drift_hidden), s2)       # drift Linear(64, H)
    b2 = u(ks[7], (hidden_size,), s2)
    return dict(
        wih_t=wih.T, whh_t=whh.T, bih=bih[None, :], bhh=bhh[None, :],
        w1_t=w1.T, b1=b1[None, :], w2_t=w2.T, b2=b2[None, :],
    )


if __name__ == "__main__":
    S, B, D, H = 8, 4, 8, 32
    key = jax.random.PRNGKey(0)
    kx, kp = jax.random.split(key)
    x = jax.random.normal(kx, (S, B, D), dtype=jnp.float32)
    t = jnp.arange(S, dtype=jnp.float32) * 0.13        # seq_len time stamps
    params = init_params(kp, D, H)

    out, dts, nsub = odegru_forward(x, t, params)
    out = jax.block_until_ready(out)
    assert out.shape == (S, B, H) and out.dtype == jnp.float32

    ref = jax.block_until_ready(odegru_reference(x, dts, nsub, params))
    np.testing.assert_allclose(np.asarray(out), np.asarray(ref), rtol=2e-3, atol=2e-3)

    print("KERNEL_OK")
</pallas_src>

<mosaic_0001>
module attributes {stable_mosaic.version = 11 : i64} {
  func.func @_odegru_kernel(%arg0: memref<21xf32, #tpu.memory_space<smem>>, %arg1: memref<7xi32, #tpu.memory_space<smem>>, %arg2: memref<8x8x32xf32, #tpu.memory_space<vmem>>, %arg3: memref<8x8x32xf32, #tpu.memory_space<vmem>>, %arg4: memref<8x8x32xf32, #tpu.memory_space<vmem>>, %arg5: memref<32x32xbf16, #tpu.memory_space<vmem>>, %arg6: memref<32x32xbf16, #tpu.memory_space<vmem>>, %arg7: memref<32x32xbf16, #tpu.memory_space<vmem>>, %arg8: memref<1x32xf32, #tpu.memory_space<vmem>>, %arg9: memref<1x32xf32, #tpu.memory_space<vmem>>, %arg10: memref<1x32xf32, #tpu.memory_space<vmem>>, %arg11: memref<32x64xbf16, #tpu.memory_space<vmem>>, %arg12: memref<1x64xf32, #tpu.memory_space<vmem>>, %arg13: memref<64x32xbf16, #tpu.memory_space<vmem>>, %arg14: memref<1x32xf32, #tpu.memory_space<vmem>>, %arg15: memref<8x8x32xf32, #tpu.memory_space<vmem>>) attributes {dimension_semantics = [], scalar_prefetch = 0 : i64, scratch_operands = 0 : i64, tpu.core_type = #tpu.core_type<tc>} {
    %c0 = arith.constant 0 : index
    %c0_0 = arith.constant 0 : index
    %0 = vector.load %arg5[%c0, %c0_0] : memref<32x32xbf16, #tpu.memory_space<vmem>>, vector<32x32xbf16>
    %c0_1 = arith.constant 0 : index
    %c0_2 = arith.constant 0 : index
    %1 = vector.load %arg6[%c0_1, %c0_2] : memref<32x32xbf16, #tpu.memory_space<vmem>>, vector<32x32xbf16>
    %c0_3 = arith.constant 0 : index
    %c0_4 = arith.constant 0 : index
    %2 = vector.load %arg7[%c0_3, %c0_4] : memref<32x32xbf16, #tpu.memory_space<vmem>>, vector<32x32xbf16>
    %c0_5 = arith.constant 0 : index
    %c0_6 = arith.constant 0 : index
    %3 = vector.load %arg11[%c0_5, %c0_6] : memref<32x64xbf16, #tpu.memory_space<vmem>>, vector<32x64xbf16>
    %c0_7 = arith.constant 0 : index
    %c0_8 = arith.constant 0 : index
    %4 = vector.load %arg13[%c0_7, %c0_8] : memref<64x32xbf16, #tpu.memory_space<vmem>>, vector<64x32xbf16>
    %c0_9 = arith.constant 0 : index
    %c0_10 = arith.constant 0 : index
    %5 = vector.load %arg8[%c0_9, %c0_10] : memref<1x32xf32, #tpu.memory_space<vmem>>, vector<1x32xf32>
    %6 = vector.shape_cast %5 : vector<1x32xf32> to vector<1x32xf32>
    %7 = vector.broadcast %6 : vector<1x32xf32> to vector<8x32xf32>
    %c0_11 = arith.constant 0 : index
    %c0_12 = arith.constant 0 : index
    %8 = vector.load %arg9[%c0_11, %c0_12] : memref<1x32xf32, #tpu.memory_space<vmem>>, vector<1x32xf32>
    %9 = vector.shape_cast %8 : vector<1x32xf32> to vector<1x32xf32>
    %10 = vector.broadcast %9 : vector<1x32xf32> to vector<8x32xf32>
    %c0_13 = arith.constant 0 : index
    %c0_14 = arith.constant 0 : index
    %11 = vector.load %arg10[%c0_13, %c0_14] : memref<1x32xf32, #tpu.memory_space<vmem>>, vector<1x32xf32>
    %12 = vector.shape_cast %11 : vector<1x32xf32> to vector<1x32xf32>
    %13 = vector.broadcast %12 : vector<1x32xf32> to vector<8x32xf32>
    %c0_15 = arith.constant 0 : index
    %c0_16 = arith.constant 0 : index
    %14 = vector.load %arg12[%c0_15, %c0_16] : memref<1x64xf32, #tpu.memory_space<vmem>>, vector<1x64xf32>
    %15 = vector.shape_cast %14 : vector<1x64xf32> to vector<1x64xf32>
    %16 = vector.broadcast %15 : vector<1x64xf32> to vector<8x64xf32>
    %c0_17 = arith.constant 0 : index
    %c0_18 = arith.constant 0 : index
    %17 = vector.load %arg14[%c0_17, %c0_18] : memref<1x32xf32, #tpu.memory_space<vmem>>, vector<1x32xf32>
    %18 = vector.shape_cast %17 : vector<1x32xf32> to vector<1x32xf32>
    %19 = vector.broadcast %18 : vector<1x32xf32> to vector<8x32xf32>
    %cst = arith.constant 0.000000e+00 : f32
    %20 = vector.broadcast %cst : f32 to vector<8x32xf32>
    %c0_i32 = arith.constant 0 : i32
    %c7_i32 = arith.constant 7 : i32
    %21 = arith.addi %c0_i32, %c7_i32 : i32
    %c1_i32 = arith.constant 1 : i32
    %22 = scf.for %arg16 = %c0_i32 to %21 step %c1_i32 iter_args(%arg17 = %20) -> (vector<8x32xf32>)  : i32 {
      %c7_i32_38 = arith.constant 7 : i32
      %59 = arith.subi %c7_i32_38, %arg16 : i32
      %60 = arith.index_cast %59 : i32 to index
      %c0_39 = arith.constant 0 : index
      %c0_40 = arith.constant 0 : index
      %61 = vector.load %arg2[%60, %c0_39, %c0_40] : memref<8x8x32xf32, #tpu.memory_space<vmem>>, vector<1x8x32xf32>
      %62 = vector.shape_cast %61 : vector<1x8x32xf32> to vector<8x32xf32>
      %63 = arith.index_cast %59 : i32 to index
      %c0_41 = arith.constant 0 : index
      %c0_42 = arith.constant 0 : index
      %64 = vector.load %arg3[%63, %c0_41, %c0_42] : memref<8x8x32xf32, #tpu.memory_space<vmem>>, vector<1x8x32xf32>
      %65 = vector.shape_cast %64 : vector<1x8x32xf32> to vector<8x32xf32>
      %66 = arith.index_cast %59 : i32 to index
      %c0_43 = arith.constant 0 : index
      %c0_44 = arith.constant 0 : index
      %67 = vector.load %arg4[%66, %c0_43, %c0_44] : memref<8x8x32xf32, #tpu.memory_space<vmem>>, vector<1x8x32xf32>
      %68 = vector.shape_cast %67 : vector<1x8x32xf32> to vector<8x32xf32>
      %69 = arith.truncf %arg17 : vector<8x32xf32> to vector<8x32xbf16>
      %cst_45 = arith.constant dense<0.000000e+00> : vector<8x32xf32>
      %70 = tpu.matmul %69, %0, %cst_45 {dimension_numbers = #tpu.dot_dimension_numbers<[1], [0], [0], [1], [0, 0, 1, 1], [], []>} : vector<8x32xbf16>, vector<32x32xbf16>, vector<8x32xf32> -> vector<8x32xf32>
      %71 = arith.addf %70, %7 : vector<8x32xf32>
      %cst_46 = arith.constant dense<0.000000e+00> : vector<8x32xf32>
      %72 = tpu.matmul %69, %1, %cst_46 {dimension_numbers = #tpu.dot_dimension_numbers<[1], [0], [0], [1], [0, 0, 1, 1], [], []>} : vector<8x32xbf16>, vector<32x32xbf16>, vector<8x32xf32> -> vector<8x32xf32>
      %73 = arith.addf %72, %10 : vector<8x32xf32>
      %cst_47 = arith.constant dense<0.000000e+00> : vector<8x32xf32>
      %74 = tpu.matmul %69, %2, %cst_47 {dimension_numbers = #tpu.dot_dimension_numbers<[1], [0], [0], [1], [0, 0, 1, 1], [], []>} : vector<8x32xbf16>, vector<32x32xbf16>, vector<8x32xf32> -> vector<8x32xf32>
      %75 = arith.addf %74, %13 : vector<8x32xf32>
      %76 = arith.addf %62, %71 : vector<8x32xf32>
      %77 = arith.negf %76 : vector<8x32xf32>
      %78 = math.exp %77 : vector<8x32xf32>
      %cst_48 = arith.constant 1.000000e+00 : f32
      %79 = vector.broadcast %cst_48 : f32 to vector<8x32xf32>
      %80 = arith.addf %79, %78 : vector<8x32xf32>
      %81 = arith.divf %79, %80 : vector<8x32xf32>
      %82 = arith.addf %65, %73 : vector<8x32xf32>
      %83 = arith.negf %82 : vector<8x32xf32>
      %84 = math.exp %83 : vector<8x32xf32>
      %cst_49 = arith.constant 1.000000e+00 : f32
      %85 = vector.broadcast %cst_49 : f32 to vector<8x32xf32>
      %86 = arith.addf %85, %84 : vector<8x32xf32>
      %87 = arith.divf %85, %86 : vector<8x32xf32>
      %88 = arith.mulf %81, %75 : vector<8x32xf32>
      %89 = arith.addf %68, %88 : vector<8x32xf32>
      %90 = math.tanh %89 : vector<8x32xf32>
      %cst_50 = arith.constant 1.000000e+00 : f32
      %91 = vector.broadcast %cst_50 : f32 to vector<8x32xf32>
      %92 = arith.subf %91, %87 : vector<8x32xf32>
      %93 = arith.mulf %92, %90 : vector<8x32xf32>
      %94 = arith.mulf %87, %arg17 : vector<8x32xf32>
      %95 = arith.addf %93, %94 : vector<8x32xf32>
      %c3_i32 = arith.constant 3 : i32
      %96 = arith.muli %arg16, %c3_i32 : i32
      %97 = arith.index_cast %arg16 : i32 to index
      %98 = memref.load %arg1[%97] : memref<7xi32, #tpu.memory_space<smem>>
      %c0_i32_51 = arith.constant 0 : i32
      %99 = arith.subi %98, %c0_i32_51 : i32
      %100 = arith.addi %c0_i32_51, %99 : i32
      %c1_i32_52 = arith.constant 1 : i32
      %101 = scf.for %arg18 = %c0_i32_51 to %100 step %c1_i32_52 iter_args(%arg19 = %95) -> (vector<8x32xf32>)  : i32 {
        %106 = arith.addi %96, %arg18 : i32
        %107 = arith.index_cast %106 : i32 to index
        %108 = memref.load %arg0[%107] : memref<21xf32, #tpu.memory_space<smem>>
        %cst_55 = arith.constant 0.333333343 : f32
        %109 = arith.mulf %108, %cst_55 : f32
        %cst_56 = arith.constant 1.250000e-01 : f32
        %110 = arith.mulf %108, %cst_56 : f32
        %111 = vector.broadcast %108 : f32 to vector<8x32xf32>
        %112 = vector.broadcast %109 : f32 to vector<8x32xf32>
        %113 = vector.broadcast %110 : f32 to vector<8x32xf32>
        %114 = arith.truncf %arg19 : vector<8x32xf32> to vector<8x32xbf16>
        %cst_57 = arith.constant dense<0.000000e+00> : vector<8x64xf32>
        %115 = tpu.matmul %114, %3, %cst_57 {dimension_numbers = #tpu.dot_dimension_numbers<[1], [0], [0], [1], [0, 0, 1, 1], [], []>} : vector<8x32xbf16>, vector<32x64xbf16>, vector<8x64xf32> -> vector<8x64xf32>
        %116 = arith.addf %115, %16 : vector<8x64xf32>
        %117 = math.tanh %116 : vector<8x64xf32>
        %118 = arith.truncf %117 : vector<8x64xf32> to vector<8x64xbf16>
        %cst_58 = arith.constant dense<0.000000e+00> : vector<8x32xf32>
        %119 = tpu.matmul %118, %4, %cst_58 {dimension_numbers = #tpu.dot_dimension_numbers<[1], [0], [0], [1], [0, 0, 1, 1], [], []>} : vector<8x64xbf16>, vector<64x32xbf16>, vector<8x32xf32> -> vector<8x32xf32>
        %120 = arith.addf %119, %19 : vector<8x32xf32>
        %121 = arith.mulf %112, %120 : vector<8x32xf32>
        %122 = arith.addf %arg19, %121 : vector<8x32xf32>
        %123 = arith.truncf %122 : vector<8x32xf32> to vector<8x32xbf16>
        %cst_59 = arith.constant dense<0.000000e+00> : vector<8x64xf32>
        %124 = tpu.matmul %123, %3, %cst_59 {dimension_numbers = #tpu.dot_dimension_numbers<[1], [0], [0], [1], [0, 0, 1, 1], [], []>} : vector<8x32xbf16>, vector<32x64xbf16>, vector<8x64xf32> -> vector<8x64xf32>
        %125 = arith.addf %124, %16 : vector<8x64xf32>
        %126 = math.tanh %125 : vector<8x64xf32>
        %127 = arith.truncf %126 : vector<8x64xf32> to vector<8x64xbf16>
        %cst_60 = arith.constant dense<0.000000e+00> : vector<8x32xf32>
        %128 = tpu.matmul %127, %4, %cst_60 {dimension_numbers = #tpu.dot_dimension_numbers<[1], [0], [0], [1], [0, 0, 1, 1], [], []>} : vector<8x64xbf16>, vector<64x32xbf16>, vector<8x32xf32> -> vector<8x32xf32>
        %129 = arith.addf %128, %19 : vector<8x32xf32>
        %130 = arith.mulf %111, %129 : vector<8x32xf32>
        %131 = arith.addf %arg19, %130 : vector<8x32xf32>
        %132 = arith.subf %131, %121 : vector<8x32xf32>
        %133 = arith.truncf %132 : vector<8x32xf32> to vector<8x32xbf16>
        %cst_61 = arith.constant dense<0.000000e+00> : vector<8x64xf32>
        %134 = tpu.matmul %133, %3, %cst_61 {dimension_numbers = #tpu.dot_dimension_numbers<[1], [0], [0], [1], [0, 0, 1, 1], [], []>} : vector<8x32xbf16>, vector<32x64xbf16>, vector<8x64xf32> -> vector<8x64xf32>
        %135 = arith.addf %134, %16 : vector<8x64xf32>
        %136 = math.tanh %135 : vector<8x64xf32>
        %137 = arith.truncf %136 : vector<8x64xf32> to vector<8x64xbf16>
        %cst_62 = arith.constant dense<0.000000e+00> : vector<8x32xf32>
        %138 = tpu.matmul %137, %4, %cst_62 {dimension_numbers = #tpu.dot_dimension_numbers<[1], [0], [0], [1], [0, 0, 1, 1], [], []>} : vector<8x64xbf16>, vector<64x32xbf16>, vector<8x32xf32> -> vector<8x32xf32>
        %139 = arith.addf %138, %19 : vector<8x32xf32>
        %140 = arith.subf %120, %129 : vector<8x32xf32>
        %141 = arith.addf %140, %139 : vector<8x32xf32>
        %142 = arith.mulf %111, %141 : vector<8x32xf32>
        %143 = arith.addf %arg19, %142 : vector<8x32xf32>
        %144 = arith.truncf %143 : vector<8x32xf32> to vector<8x32xbf16>
        %cst_63 = arith.constant dense<0.000000e+00> : vector<8x64xf32>
        %145 = tpu.matmul %144, %3, %cst_63 {dimension_numbers = #tpu.dot_dimension_numbers<[1], [0], [0], [1], [0, 0, 1, 1], [], []>} : vector<8x32xbf16>, vector<32x64xbf16>, vector<8x64xf32> -> vector<8x64xf32>
        %146 = arith.addf %145, %16 : vector<8x64xf32>
        %147 = math.tanh %146 : vector<8x64xf32>
        %148 = arith.truncf %147 : vector<8x64xf32> to vector<8x64xbf16>
        %cst_64 = arith.constant dense<0.000000e+00> : vector<8x32xf32>
        %149 = tpu.matmul %148, %4, %cst_64 {dimension_numbers = #tpu.dot_dimension_numbers<[1], [0], [0], [1], [0, 0, 1, 1], [], []>} : vector<8x64xbf16>, vector<64x32xbf16>, vector<8x32xf32> -> vector<8x32xf32>
        %150 = arith.addf %149, %19 : vector<8x32xf32>
        %151 = arith.addf %129, %139 : vector<8x32xf32>
        %cst_65 = arith.constant 3.000000e+00 : f32
        %152 = vector.broadcast %cst_65 : f32 to vector<8x32xf32>
        %153 = arith.mulf %152, %151 : vector<8x32xf32>
        %154 = arith.addf %120, %153 : vector<8x32xf32>
        %155 = arith.addf %154, %150 : vector<8x32xf32>
        %156 = arith.mulf %113, %155 : vector<8x32xf32>
        %157 = arith.addf %arg19, %156 : vector<8x32xf32>
        scf.yield %157 : vector<8x32xf32>
      }
      %102 = arith.index_cast %59 : i32 to index
      %c0_53 = arith.constant 0 : index
      %c0_54 = arith.constant 0 : index
      %103 = vector.load %arg15[%102, %c0_53, %c0_54] : memref<8x8x32xf32, #tpu.memory_space<vmem>>, vector<1x8x32xf32>
      %104 = vector.shape_cast %103 : vector<1x8x32xf32> to vector<8x32xf32>
      %105 = vector.shape_cast %101 : vector<8x32xf32> to vector<1x8x32xf32>
      tpu.vector_store %arg15[%102, %c0_53, %c0_54], %105 {strides = array<i32>} : memref<8x8x32xf32, #tpu.memory_space<vmem>>, vector<1x8x32xf32>,
      scf.yield %101 : vector<8x32xf32>
    }
    %c7_i32_19 = arith.constant 7 : i32
    %c0_20 = arith.constant 0 : index
    %c0_21 = arith.constant 0 : index
    %c0_22 = arith.constant 0 : index
    %23 = vector.load %arg2[%c0_20, %c0_21, %c0_22] : memref<8x8x32xf32, #tpu.memory_space<vmem>>, vector<1x8x32xf32>
    %24 = vector.shape_cast %23 : vector<1x8x32xf32> to vector<8x32xf32>
    %c0_23 = arith.constant 0 : index
    %c0_24 = arith.constant 0 : index
    %c0_25 = arith.constant 0 : index
    %25 = vector.load %arg3[%c0_23, %c0_24, %c0_25] : memref<8x8x32xf32, #tpu.memory_space<vmem>>, vector<1x8x32xf32>
    %26 = vector.shape_cast %25 : vector<1x8x32xf32> to vector<8x32xf32>
    %c0_26 = arith.constant 0 : index
    %c0_27 = arith.constant 0 : index
    %c0_28 = arith.constant 0 : index
    %27 = vector.load %arg4[%c0_26, %c0_27, %c0_28] : memref<8x8x32xf32, #tpu.memory_space<vmem>>, vector<1x8x32xf32>
    %28 = vector.shape_cast %27 : vector<1x8x32xf32> to vector<8x32xf32>
    %29 = arith.truncf %22 : vector<8x32xf32> to vector<8x32xbf16>
    %cst_29 = arith.constant dense<0.000000e+00> : vector<8x32xf32>
    %30 = tpu.matmul %29, %0, %cst_29 {dimension_numbers = #tpu.dot_dimension_numbers<[1], [0], [0], [1], [0, 0, 1, 1], [], []>} : vector<8x32xbf16>, vector<32x32xbf16>, vector<8x32xf32> -> vector<8x32xf32>
    %31 = arith.addf %30, %7 : vector<8x32xf32>
    %cst_30 = arith.constant dense<0.000000e+00> : vector<8x32xf32>
    %32 = tpu.matmul %29, %1, %cst_30 {dimension_numbers = #tpu.dot_dimension_numbers<[1], [0], [0], [1], [0, 0, 1, 1], [], []>} : vector<8x32xbf16>, vector<32x32xbf16>, vector<8x32xf32> -> vector<8x32xf32>
    %33 = arith.addf %32, %10 : vector<8x32xf32>
    %cst_31 = arith.constant dense<0.000000e+00> : vector<8x32xf32>
    %34 = tpu.matmul %29, %2, %cst_31 {dimension_numbers = #tpu.dot_dimension_numbers<[1], [0], [0], [1], [0, 0, 1, 1], [], []>} : vector<8x32xbf16>, vector<32x32xbf16>, vector<8x32xf32> -> vector<8x32xf32>
    %35 = arith.addf %34, %13 : vector<8x32xf32>
    %36 = arith.addf %24, %31 : vector<8x32xf32>
    %37 = arith.negf %36 : vector<8x32xf32>
    %38 = math.exp %37 : vector<8x32xf32>
    %cst_32 = arith.constant 1.000000e+00 : f32
    %39 = vector.broadcast %cst_32 : f32 to vector<8x32xf32>
    %40 = arith.addf %39, %38 : vector<8x32xf32>
    %41 = arith.divf %39, %40 : vector<8x32xf32>
    %42 = arith.addf %26, %33 : vector<8x32xf32>
    %43 = arith.negf %42 : vector<8x32xf32>
    %44 = math.exp %43 : vector<8x32xf32>
    %cst_33 = arith.constant 1.000000e+00 : f32
    %45 = vector.broadcast %cst_33 : f32 to vector<8x32xf32>
    %46 = arith.addf %45, %44 : vector<8x32xf32>
    %47 = arith.divf %45, %46 : vector<8x32xf32>
    %48 = arith.mulf %41, %35 : vector<8x32xf32>
    %49 = arith.addf %28, %48 : vector<8x32xf32>
    %50 = math.tanh %49 : vector<8x32xf32>
    %cst_34 = arith.constant 1.000000e+00 : f32
    %51 = vector.broadcast %cst_34 : f32 to vector<8x32xf32>
    %52 = arith.subf %51, %47 : vector<8x32xf32>
    %53 = arith.mulf %52, %50 : vector<8x32xf32>
    %54 = arith.mulf %47, %22 : vector<8x32xf32>
    %55 = arith.addf %53, %54 : vector<8x32xf32>
    %c0_35 = arith.constant 0 : index
    %c0_36 = arith.constant 0 : index
    %c0_37 = arith.constant 0 : index
    %56 = vector.load %arg15[%c0_35, %c0_36, %c0_37] : memref<8x8x32xf32, #tpu.memory_space<vmem>>, vector<1x8x32xf32>
    %57 = vector.shape_cast %56 : vector<1x8x32xf32> to vector<8x32xf32>
    %58 = vector.shape_cast %55 : vector<8x32xf32> to vector<1x8x32xf32>
    tpu.vector_store %arg15[%c0_35, %c0_36, %c0_37], %58 {strides = array<i32>} : memref<8x8x32xf32, #tpu.memory_space<vmem>>, vector<1x8x32xf32>,
    return
  }
}

</mosaic_0001>

<bundles_post_ra>
// kernel: tpu_custom_call.1
= control target key start
LH: loop header
LB: loop body
LE: loop exit
PB: predicated region body
PF: predicated region fallthrough
CT: control target
= control target key end

     0   :  { %20 = vsyncpa [#allocation5], 0  ;;  %s2097_s0 = inlined_call_operand.hbm [shape: f32[21], index: 0, kind: input, shape index: {}]   ;;  %s2098_s1 = inlined_call_operand.vmem [shape: s32[7], index: 1, kind: input, shape index: {}]   ;;  %s2099_s2 = inlined_call_operand.hbm [shape: f32[8,8,32], index: 2, kind: input, shape index: {}]   ;;  %s2100_s3 = inlined_call_operand.hbm [shape: f32[8,8,32], index: 3, kind: input, shape index: {}]   ;;  %s2101_s4 = inlined_call_operand.hbm [shape: f32[8,8,32], index: 4, kind: input, shape index: {}]   ;;  %s2102_s5 = inlined_call_operand.vmem [shape: bf16[32,32], index: 5, kind: input, shape index: {}]   ;;  %s2103_s6 = inlined_call_operand.vmem [shape: bf16[32,32], index: 6, kind: input, shape index: {}]   ;;  %s2104_s7 = inlined_call_operand.vmem [shape: bf16[32,32], index: 7, kind: input, shape index: {}]   ;;  %s2105_s8 = inlined_call_operand.vmem [shape: f32[1,32], index: 8, kind: input, shape index: {}]   ;;  %s2106_s9 = inlined_call_operand.hbm [shape: f32[1,32], index: 9, kind: input, shape index: {}]   ;;  %s2107_s10 = inlined_call_operand.vmem [shape: f32[1,32], index: 10, kind: input, shape index: {}]   ;;  %s2108_s11 = inlined_call_operand.vmem [shape: bf16[32,64], index: 11, kind: input, shape index: {}]   ;;  %s2109_s12 = inlined_call_operand.vmem [shape: f32[1,64], index: 12, kind: input, shape index: {}]   ;;  %s2110_s13 = inlined_call_operand.vmem [shape: bf16[64,32], index: 13, kind: input, shape index: {}]   ;;  %s2111_s14 = inlined_call_operand.vmem [shape: f32[1,32], index: 14, kind: input, shape index: {}]   ;;  %s2112_s15 = inlined_call_operand.hbm [shape: f32[8,8,32], index: 15, kind: output, shape index: {}]  }
   0x1   :  { %21 = vsyncpa [#allocation6], 0 }
   0x2   :  { %22 = vsyncpa [#allocation3], 0 }
   0x3   :  { %23 = vsyncpa [#allocation10], 0 }
   0x4   :  { %24 = vsyncpa [#allocation13], 0 }
   0x5   :  { %25 = vsyncpa [#allocation4], 0  ;;  %s1529_s18 = smov [#allocation9]   ;;  %s40_s22 = sshll.u32 %s2098_s1, 4  ;;  %s1627_s22 = int_to_ptr.vmem [resolvable:$true] %s40_s22 }
   0x6   :  { %s61_s19 = sshll.u32 %s1529_s18, 4  ;;  %s1345_s25 = scalar_lea.hbm %s2100_s3, 1024  ;;  %s62_s19 = int_to_ptr.vmem [resolvable:$true] %s61_s19 }
   0x7   :  { %p1346_p0 = scmp.ne.s32.totalorder %s2100_s3, %s1345_s25  ;;  %p1349_p1 = scmp.lt.u32.totalorder %s1345_s25, %s2100_s3 }
   0x9   :  { %p1351_p2 = pnand %p1349_p1, %p1346_p0 }
   0xb   :  { %1354 = shalt.err (!%p1351_p2)
}
   0xc   :  { %s1355_s30 = scalar_lea.vmem %s62_s19, 1024  ;;  %p1360_p4 = scmp.lt.s32.totalorder %s62_s19, %s62_s19 }
   0xd   :  { %p1356_p3 = scmp.ne.s32.totalorder %s62_s19, %s1355_s30  ;;  %p1361_p5 = scmp.lt.s32.totalorder %s1355_s30, %s1355_s30 }
   0xf   :  { %p1362_p6 = por %p1361_p5, %p1360_p4 }
  0x11   :  { %p1363_p7 = pnand %p1362_p6, %p1356_p3 }
  0x13   :  { %1366 = shalt.err (!%p1363_p7)
}
  0x14   :  { %s1530_s1 = smov 128   ;;  %s1531_s16 = smov 8  }
  0x15   :  { %67 = dma.hbm_to_vmem [thread:$0]  %s2100_s3, 1024, %s62_s19, [#allocation10], %s1530_s1, %s1530_s1, %s1531_s16  }
  0x16   :  { %s1367_s23 = scalar_lea.hbm %s2097_s0, 16 }
  0x17   :  { %p1368_p8 = scmp.ne.s32.totalorder %s2097_s0, %s1367_s23  ;;  %p1371_p9 = scmp.lt.u32.totalorder %s1367_s23, %s2097_s0 }
  0x19   :  { %p1373_p10 = pnand %p1371_p9, %p1368_p8 }
  0x1b   :  { %1376 = shalt.err (!%p1373_p10)
}
  0x1c   :  { %s1532_s28 = smov [#allocation2]   ;;  %s1377_s3 = scalar_lea.vmem %s1627_s22, 16 }
  0x1d   :  { %33 = dma.hbm_to_smem %s2097_s0, 16, %s1532_s28, [#allocation5]  }
  0x1e   :  { %p1378_p11 = scmp.ne.s32.totalorder %s1627_s22, %s1377_s3  ;;  %p1382_p12 = scmp.lt.s32.totalorder %s1627_s22, %s1627_s22 }
  0x1f   :  { %p1383_p13 = scmp.lt.s32.totalorder %s1377_s3, %s1377_s3 }
  0x21   :  { %p1384_p0 = por %p1383_p13, %p1382_p12 }
  0x23   :  { %p1385_p1 = pnand %p1384_p0, %p1378_p11 }
  0x25   :  { %1388 = shalt.err (!%p1385_p1)
}
  0x26   :  { %s1533_s19 = smov [#allocation7]   ;;  %s1534_s17 = smov [#allocation8]  }
  0x27   :  { %43 = dma.vmem_to_smem %s1627_s22, 16, %s1533_s19, [#allocation6]  }
  0x28   :  { %s49_s18 = sshll.u32 %s1534_s17, 4  ;;  %s1535_s20 = smov [#allocation11]   ;;  %s50_s18 = int_to_ptr.vmem [resolvable:$true] %s49_s18 }
  0x29   :  { %s73_s21 = sshll.u32 %s1535_s20, 4  ;;  %s1389_s0 = scalar_lea.hbm %s2099_s2, 1024  ;;  %s74_s21 = int_to_ptr.vmem [resolvable:$true] %s73_s21 }
  0x2a   :  { %p1390_p2 = scmp.ne.s32.totalorder %s2099_s2, %s1389_s0  ;;  %p1393_p3 = scmp.lt.u32.totalorder %s1389_s0, %s2099_s2 }
  0x2c   :  { %p1395_p4 = pnand %p1393_p3, %p1390_p2 }
  0x2e   :  { %1398 = shalt.err (!%p1395_p4)
}
  0x2f   :  { %s1399_s22 = scalar_lea.vmem %s50_s18, 1024  ;;  %p1404_p6 = scmp.lt.s32.totalorder %s50_s18, %s50_s18 }
  0x30   :  { %p1400_p5 = scmp.ne.s32.totalorder %s50_s18, %s1399_s22  ;;  %p1405_p7 = scmp.lt.s32.totalorder %s1399_s22, %s1399_s22 }
  0x32   :  { %p1406_p8 = por %p1405_p7, %p1404_p6 }
  0x34   :  { %p1407_p9 = pnand %p1406_p8, %p1400_p5 }
  0x36   :  { %1410 = shalt.err (!%p1407_p9)
}
  0x37   :  { %55 = dma.hbm_to_vmem [thread:$0]  %s2099_s2, 1024, %s50_s18, [#allocation3], %s1530_s1, %s1530_s1, %s1531_s16  }
  0x38   :  { %s1411_s17 = scalar_lea.hbm %s2101_s4, 1024 }
  0x39   :  { %p1412_p10 = scmp.ne.s32.totalorder %s2101_s4, %s1411_s17  ;;  %p1415_p11 = scmp.lt.u32.totalorder %s1411_s17, %s2101_s4 }
  0x3b   :  { %p1417_p12 = pnand %p1415_p11, %p1412_p10 }
  0x3d   :  { %1420 = shalt.err (!%p1417_p12)
}
  0x3e   :  { %s1421_s25 = scalar_lea.vmem %s74_s21, 1024  ;;  %p1426_p0 = scmp.lt.s32.totalorder %s74_s21, %s74_s21 }
  0x3f   :  { %p1422_p13 = scmp.ne.s32.totalorder %s74_s21, %s1421_s25  ;;  %p1427_p1 = scmp.lt.s32.totalorder %s1421_s25, %s1421_s25 }
  0x41   :  { %p1428_p2 = por %p1427_p1, %p1426_p0 }
  0x43   :  { %p1429_p3 = pnand %p1428_p2, %p1422_p13 }
  0x45   :  { %1432 = shalt.err (!%p1429_p3)
}
  0x46   :  { %79 = dma.hbm_to_vmem [thread:$0]  %s2101_s4, 1024, %s74_s21, [#allocation10], %s1530_s1, %s1530_s1, %s1531_s16  }
  0x47   :  { %s1536_s26 = smov [#allocation12]   ;;  %s1433_s29 = scalar_lea.hbm %s2106_s9, 16 }
  0x48   :  { %s94_s27 = sshll.u32 %s1536_s26, 4  ;;  %p1434_p4 = scmp.ne.s32.totalorder %s2106_s9, %s1433_s29  ;;  %s95_s27 = int_to_ptr.vmem [resolvable:$true] %s94_s27 }
  0x49   :  { %p1437_p5 = scmp.lt.u32.totalorder %s1433_s29, %s2106_s9 }
  0x4b   :  { %p1439_p6 = pnand %p1437_p5, %p1434_p4 }
  0x4d   :  { %1442 = shalt.err (!%p1439_p6)
}
  0x4e   :  { %s1443_s20 = scalar_lea.vmem %s95_s27, 16  ;;  %s1447_s4 = scalar_lea.vmem %s95_s27, 32 }
  0x4f   :  { %p1444_p7 = scmp.ne.s32.totalorder %s95_s27, %s1443_s20  ;;  %p1448_p8 = scmp.lt.s32.totalorder %s95_s27, %s95_s27 }
  0x50   :  { %p1449_p9 = scmp.lt.s32.totalorder %s1447_s4, %s1443_s20 }
  0x52   :  { %p1450_p10 = por %p1449_p9, %p1448_p8 }
  0x54   :  { %p1451_p11 = pnand %p1450_p10, %p1444_p7 }
  0x56   :  { %1454 = shalt.err (!%p1451_p11)
}
  0x57   :  { %97 = dma.hbm_to_vmem [thread:$0]  %s2106_s9, 16, %s95_s27, [#allocation13]  }
  0x58   :  { %1497 = dma.done.wait [#allocation5], 16  }
  0x59   :  { %1498 = vsyncadd [#allocation5], 4294967280 }
  0x5a   :  { %1499 = dma.done.wait [#allocation6], 16  }
  0x5b   :  { %1500 = vsyncadd [#allocation6], 4294967280 }
  0x5c   :  { %1501 = dma.done.wait [#allocation3], 1024  }
  0x5d   :  { %1502 = vsyncadd [#allocation3], 4294966272 }
  0x5e   :  { %1503 = dma.done.wait [#allocation10], 2048  }
  0x5f   :  { %1504 = vsyncadd [#allocation10], 4294965248 }
  0x60   :  { %1505 = dma.done.wait [#allocation13], 16  }
  0x61   :  { %1506 = vsyncadd [#allocation13], 4294967280 }
  0x62   :  { %126 = sfence }
  0x63   :  { %v1706_v0 = vld [vmem:[%s2102_s5] sm:$0xf]  ;;  %v1711_v1 = vld [vmem:[%s2102_s5 + $0x4] sm:$0xf]  ;;  %v1716_v2 = vld [vmem:[%s2102_s5 + $0x8] sm:$0xf] }
  0x64   :  { %v1721_v3 = vld [vmem:[%s2102_s5 + $0xc] sm:$0xf]  ;;  %v1726_v4 = vld [vmem:[%s2103_s6] sm:$0xf]  ;;  %v1731_v5 = vld [vmem:[%s2103_s6 + $0x4] sm:$0xf] }
  0x65   :  { %v1736_v6 = vld [vmem:[%s2103_s6 + $0x8] sm:$0xf]  ;;  %v1741_v7 = vld [vmem:[%s2103_s6 + $0xc] sm:$0xf]  ;;  %v1746_v8 = vld [vmem:[%s2104_s7] sm:$0xf] }
  0x66   :  { %v1751_v9 = vld [vmem:[%s2104_s7 + $0x4] sm:$0xf]  ;;  %v1756_v10 = vld [vmem:[%s2104_s7 + $0x8] sm:$0xf]  ;;  %v1761_v11 = vld [vmem:[%s2104_s7 + $0xc] sm:$0xf] }
  0x67   :  { %v1766_v12 = vld [vmem:[%s2108_s11] sm:$0xf]  ;;  %v1771_v13 = vld [vmem:[%s2108_s11 + $0x4] sm:$0xf]  ;;  %v1776_v14 = vld [vmem:[%s2108_s11 + $0x8] sm:$0xf] }
  0x68   :  { %v1781_v15 = vld [vmem:[%s2108_s11 + $0xc] sm:$0xf]  ;;  %v1786_v16 = vld [vmem:[%s2110_s13] sm:$0xf]  ;;  %v1791_v17 = vld [vmem:[%s2110_s13 + $0x4] sm:$0xf] }
  0x69   :  { %v1796_v18 = vld [vmem:[%s2110_s13 + $0x8] sm:$0xf]  ;;  %v1801_v19 = vld [vmem:[%s2110_s13 + $0xc] sm:$0xf]  ;;  %v1806_v20 = vld [vmem:[%s2110_s13 + $0x10] sm:$0xf] }
  0x6a   :  { %v1811_v21 = vld [vmem:[%s2110_s13 + $0x14] sm:$0xf]  ;;  %v1816_v22 = vld [vmem:[%s2110_s13 + $0x18] sm:$0xf]  ;;  %v1821_v23 = vld [vmem:[%s2110_s13 + $0x1c] sm:$0xf] }
  0x6b   :  { %v1826_v24 = vld [vmem:[%s2105_s8] ss:$0 sm:$0xff]  ;;  %v1845_v29 = vmov 0.0   ;;  %s1847_s8 = smov 0  }
  0x6c   :  { %v1828_v25 = vld [vmem:[#allocation12] ss:$0 sm:$0xff] }
  0x6d   :  { %v1833_v26 = vld [vmem:[%s2107_s10] ss:$0 sm:$0xff] }
  0x6e   :  { %v1838_v27 = vld [vmem:[%s2109_s12] ss:$0 sm:$0xff] }
  0x6f   :  { %v1843_v28 = vld [vmem:[%s2111_s14] ss:$0 sm:$0xff] }
  0x70 LB: > { %v1857_v30 = vcombine.low %v1706_v0, %v1711_v1  ;;  %v1537_v31 = vmov 0.0   ;;  %vm1538_vm0 = vmmov 0   ;;  %v1862_v32 = vcombine.low %v1726_v4, %v1731_v5  ;;  %s384_s10 = smul.u32 3, %s1515_s8  ;;  %s1895_s12 = sld [smem:[#allocation7 + %s1515_s8]]  ;;  %s1515_s8 = sphi %s1847_s8, %s192_s8   ;;  %v1511_v29 = vphi %v1845_v29, %v2116_v29  }
  0x71   : > { %1134 = vmatprep.subr.bf16.mxu0 %v1537_v31  ;;  %1138 = vmatprep.mubr.msk.bf16.mxu0 %vm1538_vm0, %v1537_v31  ;;  %v1867_v33 = vcombine.low %v1716_v2, %v1721_v3  ;;  %v1872_v34 = vcombine.low %v1736_v6, %v1741_v7  ;;  %v202_v35 = vpack.c.bf16 %v1511_v29, %v1511_v29  ;;  %vm215_vm1 = vcmask 261120   ;;  %s194_s14 = ssub.s32 7, %s1515_s8 }
  0x72   : > { %1135 = vmatpush3.bf16.msra.mxu0 %v1857_v30  ;;  %1142 = vmatprep.subr.bf16.mxu1 %v1537_v31  ;;  %v1880_v36 = vcombine.low %v1746_v8, %v1751_v9  ;;  %v1888_v37 = vcombine.low %v1756_v10, %v1761_v11  ;;  %s1898_s7 = sshll.u32 %s194_s14, 3 }
  0x73   : > { %1136 = vmatprep.subr.bf16.mxu0 %v1537_v31  ;;  %1143 = vmatpush3.bf16.msra.mxu1 %v1862_v32  ;;  %s196_s30 = scalar_lea.vmem [#allocation8], %s1898_s7  ;;  %s198_s3 = scalar_lea.vmem [#allocation9], %s1898_s7 }
  0x74   : > { %1144 = vmatprep.subr.bf16.mxu1 %v1537_v31  ;;  %1146 = vmatprep.mubr.msk.bf16.mxu1 %vm1538_vm0, %v1537_v31  ;;  %v197_v38 = vld [vmem:[%s196_s30] sm:$0xff]  ;;  %s200_s19 = scalar_lea.vmem [#allocation11], %s1898_s7 }
  0x75   : > { %v199_v42 = vld [vmem:[%s198_s3] sm:$0xff] }
  0x76   : > { %1137 = vmatpush3.bf16.msra.mxu0 %v1867_v33  ;;  %p1058_p12 = scmp.le.s32.totalorder %s1895_s12, 0 }
  0x77   : > { %1145 = vmatpush3.bf16.msra.mxu1 %v1872_v34  ;;  %1150 = vmatprep.subr.bf16.mxu0 %v1537_v31  ;;  %s1912_s17 = smov (!%p1058_p12), 0  }
  0x79   : > { %1139 = vmatmul.mubr.msk.bf16.vlgmr.msra.gmra.mrb[0].mxu0 %vm215_vm1, %v202_v35 }
  0x7a   : > { %1147 = vmatmul.mubr.msk.bf16.vlgmr.msra.gmra.mrb[0].mxu1 %vm215_vm1, %v202_v35  ;;  %1151 = vmatpush3.bf16.msra.mxu0 %v1880_v36 }
  0x7b   : > { %1152 = vmatprep.subr.bf16.mxu0 %v1537_v31  ;;  %1154 = vmatprep.mubr.msk.bf16.mxu0 %vm1538_vm0, %v1537_v31  ;;  %v201_v31 = vld [vmem:[%s200_s19] sm:$0xff] }
  0x7e   : > { %1153 = vmatpush3.bf16.msra.mxu0 %v1888_v37 }
  0x81   : > { %1155 = vmatmul.mubr.msk.bf16.vlgmr.msra.gmra.mrb[4].mxu0 %vm215_vm1, %v202_v35 }
 0x14c   : > { %v253_v39 = vpop.f32.mrb[0].mxu0 }
 0x14d   : > { %v254_v40 = vadd.f32 %v1826_v24, %v253_v39  ;;  %v1140_v41 = vpop.f32.mrb[1].mxu0  ;;  %v305_v43 = vpop.f32.mrb[0].mxu1 }
 0x14e   : > { %v256_v44 = vpop.f32.mrb[2].mxu0  ;;  %v306_v45 = vadd.f32 %v1828_v25, %v305_v43  ;;  %v1148_v46 = vpop.f32.mrb[1].mxu1 }
 0x14f   : > { %v363_v47 = vadd.f32 %v254_v40, %v197_v38  ;;  %v1141_v48 = vpop.f32.mrb[3].mxu0  ;;  %v308_v49 = vpop.f32.mrb[2].mxu1 }
 0x150   : > { %v370_v50 = vadd.f32 %v306_v45, %v199_v42  ;;  %v1149_v51 = vpop.f32.mrb[3].mxu1 }
 0x151   : > { %v1056_v52 = vmul.f32 -1.442695, %v363_v47 }
 0x152   : > { %v1057_v53 = vmul.f32 -1.442695, %v370_v50 }
 0x153   : > { %1317 = vpow2.f32 %v1056_v52 }
 0x154   : > { %v357_v54 = vpop.f32.mrb[4].mxu0  ;;  %1319 = vpow2.f32 %v1057_v53 }
 0x155   : > { %v1156_v55 = vpop.f32.mrb[5].mxu0  ;;  %v358_v62 = vadd.f32 %v1833_v26, %v357_v54 }
 0x156   : > { %v360_v56 = vpop.f32.mrb[6].mxu0 }
 0x157   : > { %v1157_v57 = vpop.f32.mrb[7].mxu0 }
 0x15d   : > { %v1318_v58 = vpop.eup %1317 }
 0x15e   : > { %v367_v59 = vadd.f32 1.0, %v1318_v58  ;;  %v1320_v60 = vpop.eup %1319 }
 0x15f   : > { %v374_v61 = vadd.f32 1.0, %v1320_v60 }
 0x160   : > { %1321 = vrcp.f32 %v367_v59 }
 0x161   : > { %1323 = vrcp.f32 %v374_v61 }
 0x16a   : > { %v1322_v63 = vpop.eup %1321 }
 0x16b   : > { %v377_v35 = vmul.f32 %v1322_v63, %v358_v62  ;;  %v1324_v39 = vpop.eup %1323 }
 0x16c   : > { %v380_v40 = vsub.f32 1.0, %v1324_v39  ;;  %v382_v42 = vmul.f32 %v1511_v29, %v1324_v39 }
 0x16d   : > { %v378_v38 = vadd.f32 %v377_v35, %v201_v31 }
 0x16f   : > { %1325 = vtanh.f32 %v378_v38 }
 0x178   : > { %1028 = sbr.rel (%p1058_p12) target bundleno = 2185 (0x889), region = 116 }
 0x179   : > { %v1326_v41 = vpop.eup %1325 }
 0x17a   : > { %v381_v43 = vmul.f32 %v1326_v41, %v380_v40 }
 0x17c   : > { %v383_v44 = vadd.f32 %v382_v42, %v381_v43  }
 0x17e   : > { %v2113_v45 = vmov %v383_v44 }
 0x17f LB: >> { %v1922_v29 = vcombine.low %v1766_v12, %v1771_v13  ;;  %v1539_v46 = vmov 0.0   ;;  %vm1540_vm2 = vmmov 0   ;;  %v1930_v47 = vcombine.low %v1776_v14, %v1781_v15  ;;  %s393_s20 = sadd.s32 %s1523_s17, %s384_s10  ;;  %s389_s17 = sadd.s32 1, %s1523_s17   ;;  %s1523_s17 = sphi %s1912_s17, %s389_s17   ;;  %v1519_v44 = vphi %v383_v44, %v2114_v44  }
 0x180   : >> { %1158 = vmatprep.subr.bf16.mxu1 %v1539_v46  ;;  %1162 = vmatprep.mubr.msk.bf16.mxu1 %vm1540_vm2, %v1539_v46  ;;  %v400_v48 = vpack.c.bf16 %v1519_v44, %v1519_v44  ;;  %v1949_v49 = vcombine.low %v1786_v16, %v1791_v17  ;;  %v1955_v50 = vcombine.low %v1796_v18, %v1801_v19  ;;  %vm482_vm3 = vcmask 523264   ;;  %s1982_s5 = sld [smem:[#allocation2 + %s393_s20]]  ;;  %p388_p13 = scmp.ge.s32.totalorder %s389_s17, %s1895_s12 }
 0x181   : >> { %1159 = vmatpush3.bf16.msra.mxu1 %v1922_v29  ;;  %1178 = vmatprep.subr.bf16.mxu0 %v1539_v46  ;;  %v1961_v51 = vcombine.low %v1806_v20, %v1811_v21  ;;  %v1967_v52 = vcombine.low %v1816_v22, %v1821_v23 }
 0x182   : >> { %1160 = vmatprep.subr.bf16.mxu1 %v1539_v46  ;;  %1179 = vmatpush3.bf16.msra.mxu0 %v1922_v29 }
 0x183   : >> { %1180 = vmatprep.subr.bf16.mxu0 %v1539_v46  ;;  %1182 = vmatprep.mubr.msk.bf16.mxu0 %vm1540_vm2, %v1539_v46 }
 0x185   : >> { %1161 = vmatpush3.bf16.msra.mxu1 %v1930_v47 }
 0x186   : >> { %1166 = vmatprep.subr.bf16.mxu1 %v1539_v46  ;;  %1181 = vmatpush3.bf16.msra.mxu0 %v1930_v47  ;;  %s395_s4 = smul.f32 0.33333334, %s1982_s5 }
 0x187   : >> { %1186 = vmatprep.subr.bf16.mxu0 %v1539_v46  ;;  %s396_s11 = smul.f32 0.125, %s1982_s5 }
 0x188   : >> { %1163 = vmatmul.mubr.msk.bf16.vlgmr.msra.gmra.mrb[0].mxu1 %vm215_vm1, %v400_v48  ;;  %v398_v60 = vstv %s395_s4 }
 0x189   : >> { %1174 = vmatprep.mubr.msk.bf16.mxu1 %vm1540_vm2, %v1539_v46  ;;  %1167 = vmatpush3.bf16.msra.mxu1 %v1949_v49 }
 0x18a   : >> { %1168 = vmatprep.subr.bf16.mxu1 %v1539_v46 }
 0x18d   : >> { %1169 = vmatpush3.bf16.msra.mxu1 %v1955_v50 }
 0x18e   : >> { %1170 = vmatprep.subr.bf16.mxu1 %v1539_v46 }
 0x191   : >> { %1171 = vmatpush3.bf16.msra.mxu1 %v1961_v51 }
 0x192   : >> { %1172 = vmatprep.subr.bf16.mxu1 %v1539_v46 }
 0x195   : >> { %1173 = vmatpush3.bf16.msra.mxu1 %v1967_v52 }
 0x196   : >> { %1198 = vmatprep.subr.bf16.mxu1 %v1539_v46 }
 0x25b   : >> { %v450_v53 = vpop.f32.mrb[0].mxu1 }
 0x25c   : >> { %v451_v54 = vadd.f32 %v1838_v27, %v450_v53  ;;  %v1164_v55 = vpop.f32.mrb[1].mxu1 }
 0x25d   : >> { %v453_v56 = vpop.f32.mrb[2].mxu1  ;;  %v397_v55 = vstv %s1982_s5 }
 0x25e   : >> { %1327 = vtanh.f32 %v451_v54  ;;  %v1165_v57 = vpop.f32.mrb[3].mxu1 }
 0x268   : >> { %v1328_v58 = vpop.eup %1327 }
 0x269   : >> { %v457_v59 = vpack.c.bf16 %v1328_v58, %v1328_v58 }
 0x26b   : >> { %1175 = vmatmul.mubr.msk.bf16.vlgmr.msra.gmra.mrb[4].mxu1 %vm482_vm3, %v457_v59 }
 0x26c   : >> { %1199 = vmatpush3.bf16.msra.mxu1 %v1922_v29  ;;  %1202 = vmatprep.mubr.msk.bf16.mxu1 %vm1540_vm2, %v1539_v46 }
 0x26d   : >> { %1200 = vmatprep.subr.bf16.mxu1 %v1539_v46 }
 0x270   : >> { %1201 = vmatpush3.bf16.msra.mxu1 %v1930_v47 }
 0x271   : >> { %1206 = vmatprep.subr.bf16.mxu1 %v1539_v46 }
 0x33e   : >> { %v520_v61 = vpop.f32.mrb[4].mxu1 }
 0x33f   : >> { %v1986_v62 = vadd.f32 %v1843_v28, %v520_v61  ;;  %v1176_v63 = vpop.f32.mrb[5].mxu1 }
 0x340   : >> { %v523_v31 = vpop.f32.mrb[6].mxu1 }
 0x341   : >> { %v526_v35 = vmul.f32 %v1986_v62, %v398_v60  ;;  %v1177_v38 = vpop.f32.mrb[7].mxu1 }
 0x343   : >> { %v527_v39 = vadd.f32 %v1519_v44, %v526_v35 }
 0x345   : >> { %v528_v40 = vpack.c.bf16 %v527_v39, %v527_v39 }
 0x347   : >> { %1183 = vmatmul.mubr.msk.bf16.vlgmr.msra.gmra.mrb[0].mxu0 %vm215_vm1, %v528_v40 }
 0x348   : >> { %1187 = vmatpush3.bf16.msra.mxu0 %v1949_v49  ;;  %1194 = vmatprep.mubr.msk.bf16.mxu0 %vm1540_vm2, %v1539_v46 }
 0x349   : >> { %1188 = vmatprep.subr.bf16.mxu0 %v1539_v46 }
 0x34c   : >> { %1189 = vmatpush3.bf16.msra.mxu0 %v1955_v50 }
 0x34d   : >> { %1190 = vmatprep.subr.bf16.mxu0 %v1539_v46 }
 0x350   : >> { %1191 = vmatpush3.bf16.msra.mxu0 %v1961_v51 }
 0x351   : >> { %1192 = vmatprep.subr.bf16.mxu0 %v1539_v46 }
 0x354   : >> { %1193 = vmatpush3.bf16.msra.mxu0 %v1967_v52 }
 0x355   : >> { %1218 = vmatprep.subr.bf16.mxu0 %v1539_v46 }
 0x41a   : >> { %v566_v41 = vpop.f32.mrb[0].mxu0 }
 0x41b   : >> { %v567_v42 = vadd.f32 %v1838_v27, %v566_v41  ;;  %v1184_v43 = vpop.f32.mrb[1].mxu0 }
 0x41c   : >> { %v569_v45 = vpop.f32.mrb[2].mxu0 }
 0x41d   : >> { %1329 = vtanh.f32 %v567_v42  ;;  %v1185_v48 = vpop.f32.mrb[3].mxu0 }
 0x427   : >> { %v1330_v53 = vpop.eup %1329 }
 0x428   : >> { %v573_v54 = vpack.c.bf16 %v1330_v53, %v1330_v53 }
 0x42a   : >> { %1195 = vmatmul.mubr.msk.bf16.vlgmr.msra.gmra.mrb[4].mxu0 %vm482_vm3, %v573_v54 }
 0x42b   : >> { %1219 = vmatpush3.bf16.msra.mxu0 %v1922_v29  ;;  %1222 = vmatprep.mubr.msk.bf16.mxu0 %vm1540_vm2, %v1539_v46 }
 0x42c   : >> { %1220 = vmatprep.subr.bf16.mxu0 %v1539_v46 }
 0x42f   : >> { %1221 = vmatpush3.bf16.msra.mxu0 %v1930_v47 }
 0x430   : >> { %1226 = vmatprep.subr.bf16.mxu0 %v1539_v46 }
 0x4fd   : >> { %v611_v56 = vpop.f32.mrb[4].mxu0 }
 0x4fe   : >> { %v612_v57 = vadd.f32 %v1843_v28, %v611_v56  ;;  %v1196_v58 = vpop.f32.mrb[5].mxu0 }
 0x4ff   : >> { %v614_v59 = vpop.f32.mrb[6].mxu0 }
 0x500   : >> { %v617_v60 = vmul.f32 %v612_v57, %v397_v55  ;;  %v1197_v61 = vpop.f32.mrb[7].mxu0  ;;  %v709_v48 = vsub.f32 %v1986_v62, %v612_v57 }
 0x502   : >> { %v618_v63 = vadd.f32 %v1519_v44, %v617_v60 }
 0x504   : >> { %v619_v29 = vsub.f32 %v618_v63, %v526_v35 }
 0x506   : >> { %v620_v31 = vpack.c.bf16 %v619_v29, %v619_v29 }
 0x508   : >> { %1203 = vmatmul.mubr.msk.bf16.vlgmr.msra.gmra.mrb[8].mxu1 %vm215_vm1, %v620_v31 }
 0x509   : >> { %1207 = vmatpush3.bf16.msra.mxu1 %v1949_v49  ;;  %1214 = vmatprep.mubr.msk.bf16.mxu1 %vm1540_vm2, %v1539_v46 }
 0x50a   : >> { %1208 = vmatprep.subr.bf16.mxu1 %v1539_v46 }
 0x50d   : >> { %1209 = vmatpush3.bf16.msra.mxu1 %v1955_v50 }
 0x50e   : >> { %1210 = vmatprep.subr.bf16.mxu1 %v1539_v46 }
 0x511   : >> { %1211 = vmatpush3.bf16.msra.mxu1 %v1961_v51 }
 0x512   : >> { %1212 = vmatprep.subr.bf16.mxu1 %v1539_v46 }
 0x515   : >> { %1213 = vmatpush3.bf16.msra.mxu1 %v1967_v52 }
 0x5db   : >> { %v658_v47 = vpop.f32.mrb[8].mxu1 }
 0x5dc   : >> { %v659_v35 = vadd.f32 %v1838_v27, %v658_v47  ;;  %v1204_v38 = vpop.f32.mrb[9].mxu1 }
 0x5dd   : >> { %v661_v39 = vpop.f32.mrb[10].mxu1 }
 0x5de   : >> { %1331 = vtanh.f32 %v659_v35  ;;  %v1205_v40 = vpop.f32.mrb[11].mxu1 }
 0x5df   : >> { %v399_v40 = vstv %s396_s11 }
 0x5e8   : >> { %v1332_v41 = vpop.eup %1331 }
 0x5e9   : >> { %v665_v42 = vpack.c.bf16 %v1332_v41, %v1332_v41 }
 0x5eb   : >> { %1215 = vmatmul.mubr.msk.bf16.vlgmr.msra.gmra.mrb[12].mxu1 %vm482_vm3, %v665_v42 }
 0x6be   : >> { %v703_v43 = vpop.f32.mrb[12].mxu1 }
 0x6bf   : >> { %v704_v45 = vadd.f32 %v1843_v28, %v703_v43  ;;  %v1216_v53 = vpop.f32.mrb[13].mxu1 }
 0x6c0   : >> { %v706_v54 = vpop.f32.mrb[14].mxu1 }
 0x6c1   : >> { %v710_v56 = vadd.f32 %v709_v48, %v704_v45  ;;  %v1217_v58 = vpop.f32.mrb[15].mxu1 }
 0x6c3   : >> { %v711_v59 = vmul.f32 %v710_v56, %v397_v55 }
 0x6c5   : >> { %v712_v60 = vadd.f32 %v1519_v44, %v711_v59 }
 0x6c7   : >> { %v713_v61 = vpack.c.bf16 %v712_v60, %v712_v60 }
 0x6c9   : >> { %1223 = vmatmul.mubr.msk.bf16.vlgmr.msra.gmra.mrb[8].mxu0 %vm215_vm1, %v713_v61 }
 0x6ca   : >> { %1227 = vmatpush3.bf16.msra.mxu0 %v1949_v49  ;;  %1234 = vmatprep.mubr.msk.bf16.mxu0 %vm1540_vm2, %v1539_v46 }
 0x6cb   : >> { %1228 = vmatprep.subr.bf16.mxu0 %v1539_v46 }
 0x6ce   : >> { %1229 = vmatpush3.bf16.msra.mxu0 %v1955_v50  ;;  %v802_v50 = vadd.f32 %v704_v45, %v612_v57 }
 0x6cf   : >> { %1230 = vmatprep.subr.bf16.mxu0 %v1539_v46 }
 0x6d0   : >> { %v803_v38 = vmul.f32 3.0, %v802_v50 }
 0x6d2   : >> { %1231 = vmatpush3.bf16.msra.mxu0 %v1961_v51 }
 0x6d3   : >> { %1232 = vmatprep.subr.bf16.mxu0 %v1539_v46  ;;  %v804_v46 = vadd.f32 %v803_v38, %v1986_v62 }
 0x6d6   : >> { %1233 = vmatpush3.bf16.msra.mxu0 %v1967_v52 }
 0x79c   : >> { %v751_v55 = vpop.f32.mrb[8].mxu0 }
 0x79d   : >> { %v752_v63 = vadd.f32 %v1838_v27, %v751_v55  ;;  %v1224_v49 = vpop.f32.mrb[9].mxu0 }
 0x79e   : >> { %v754_v29 = vpop.f32.mrb[10].mxu0 }
 0x79f   : >> { %1333 = vtanh.f32 %v752_v63  ;;  %v1225_v31 = vpop.f32.mrb[11].mxu0 }
 0x7a9   : >> { %v1334_v47 = vpop.eup %1333 }
 0x7aa   : >> { %v758_v35 = vpack.c.bf16 %v1334_v47, %v1334_v47 }
 0x7ac   : >> { %1235 = vmatmul.mubr.msk.bf16.vlgmr.msra.gmra.mrb[12].mxu0 %vm482_vm3, %v758_v35 }
 0x87f   : >> { %v796_v39 = vpop.f32.mrb[12].mxu0 }
 0x880   : >> { %v797_v51 = vadd.f32 %v1843_v28, %v796_v39  ;;  %v1236_v52 = vpop.f32.mrb[13].mxu0 }
 0x881   : >> { %v799_v41 = vpop.f32.mrb[14].mxu0 }
 0x882   : >> { %v805_v42 = vadd.f32 %v804_v46, %v797_v51  ;;  %v1237_v43 = vpop.f32.mrb[15].mxu0  ;;  %391 = sbr.rel (!%p388_p13) target bundleno = 383 (0x17f), region = 122 }
 0x884   : >> { %v806_v48 = vmul.f32 %v805_v42, %v399_v40 }
 0x886   : >> { %v807_v53 = vadd.f32 %v1519_v44, %v806_v48  }
 0x888   : >> { %v2114_v44 = vmov %v807_v53  ;;  %v2115_v45 = vmov (%p388_p13), %v807_v53 }
 0x889 PF: > { %s808_s21 = scalar_lea.vmem [#allocation14], %s1898_s7  ;;  %s192_s8 = sadd.s32 1, %s1515_s8   ;;  %v2116_v29 = vmov %v1527_v45  ;;  %v1527_v45 = vphi %v2113_v45, %v2115_v45  }
 0x88a   : > { %809 = vst.msk [vmem:[%s808_s21] sm:$0xff] %vm215_vm1, %v1527_v45  ;;  %p189_p0 = scmp.ge.s32.totalorder %s192_s8, 7  }
 0x88b   :  { %v1541_v44 = vmov (%p189_p0), 0.0   ;;  %vm1542_vm4 = vmmov (%p189_p0), 0   ;;  %v813_v62 = vpack.c.bf16 (%p189_p0), %v1527_v45, %v1527_v45  ;;  %v810_v0 = vld [vmem:[#allocation8] sm:$0xff] (%p189_p0)  ;;  %s1543_s23 = smov (%p189_p0), [#allocation14]  }
 0x88c   :  { %191 = sbr.rel (!%p189_p0) target bundleno = 112 (0x70), region = 133  ;;  %1238 = vmatprep.subr.bf16.mxu0 (%p189_p0), %v1541_v44  ;;  %1242 = vmatprep.mubr.msk.bf16.mxu0 (%p189_p0), %vm1542_vm4, %v1541_v44  ;;  %v811_v4 = vld [vmem:[#allocation9] sm:$0xff] (%p189_p0)  ;;  %s1001_s24 = sshll.u32 (%p189_p0), %s1543_s23, 4  ;;  %s1002_s24 = int_to_ptr.vmem [resolvable:$true] %s1001_s24 }
 0x88d   :  { %1239 = vmatpush3.bf16.msra.mxu0 (%p189_p0), %v1857_v30  ;;  %1246 = vmatprep.subr.bf16.mxu1 (%p189_p0), %v1541_v44  ;;  %v812_v27 = vld [vmem:[#allocation11] sm:$0xff] (%p189_p0)  ;;  %s1455_s0 = scalar_lea.vmem (%p189_p0), %s1002_s24, 1024  ;;  %p1460_p2 = scmp.lt.s32.totalorder (%p189_p0), %s1002_s24, %s1002_s24 }
 0x88e   :  { %1240 = vmatprep.subr.bf16.mxu0 (%p189_p0), %v1541_v44  ;;  %1247 = vmatpush3.bf16.msra.mxu1 (%p189_p0), %v1862_v32  ;;  %p1456_p1 = scmp.ne.s32.totalorder (%p189_p0), %s1002_s24, %s1455_s0  ;;  %p1461_p3 = scmp.lt.s32.totalorder (%p189_p0), %s1455_s0, %s1455_s0 }
 0x88f   :  { %1248 = vmatprep.subr.bf16.mxu1 (%p189_p0), %v1541_v44  ;;  %1250 = vmatprep.mubr.msk.bf16.mxu1 (%p189_p0), %vm1542_vm4, %v1541_v44 }
 0x890   :  { %p1462_p4 = por (%p189_p0), %p1461_p3, %p1460_p2 }
 0x891   :  { %1241 = vmatpush3.bf16.msra.mxu0 (%p189_p0), %v1867_v33 }
 0x892   :  { %1249 = vmatpush3.bf16.msra.mxu1 (%p189_p0), %v1872_v34  ;;  %1254 = vmatprep.subr.bf16.mxu0 (%p189_p0), %v1541_v44  ;;  %p1463_p5 = pnand (%p189_p0), %p1462_p4, %p1456_p1 }
 0x894   :  { %1243 = vmatmul.mubr.msk.bf16.vlgmr.msra.gmra.mrb[0].mxu0 %vm215_vm1, %v813_v62 }
 0x895   :  { %1251 = vmatmul.mubr.msk.bf16.vlgmr.msra.gmra.mrb[0].mxu1 %vm215_vm1, %v813_v62  ;;  %1255 = vmatpush3.bf16.msra.mxu0 %v1880_v36 }
 0x896   :  { %1256 = vmatprep.subr.bf16.mxu0 %v1541_v44  ;;  %1258 = vmatprep.mubr.msk.bf16.mxu0 %vm1542_vm4, %v1541_v44 }
 0x899   :  { %1257 = vmatpush3.bf16.msra.mxu0 %v1888_v37 }
 0x89c   :  { %1259 = vmatmul.mubr.msk.bf16.vlgmr.msra.gmra.mrb[4].mxu0 %vm215_vm1, %v813_v62 }
 0x967   :  { %v864_v1 = vpop.f32.mrb[0].mxu0 }
 0x968   :  { %v865_v2 = vadd.f32 %v1826_v24, %v864_v1  ;;  %v1244_v3 = vpop.f32.mrb[1].mxu0  ;;  %v916_v5 = vpop.f32.mrb[0].mxu1 }
 0x969   :  { %v867_v6 = vpop.f32.mrb[2].mxu0  ;;  %v917_v7 = vadd.f32 %v1828_v25, %v916_v5  ;;  %v1252_v8 = vpop.f32.mrb[1].mxu1 }
 0x96a   :  { %v974_v9 = vadd.f32 %v865_v2, %v810_v0  ;;  %v1245_v10 = vpop.f32.mrb[3].mxu0  ;;  %v919_v11 = vpop.f32.mrb[2].mxu1 }
 0x96b   :  { %v981_v12 = vadd.f32 %v917_v7, %v811_v4  ;;  %v1253_v13 = vpop.f32.mrb[3].mxu1 }
 0x96c   :  { %v1082_v14 = vmul.f32 -1.442695, %v974_v9 }
 0x96d   :  { %v1083_v15 = vmul.f32 -1.442695, %v981_v12 }
 0x96e   :  { %1335 = vpow2.f32 %v1082_v14 }
 0x96f   :  { %v968_v16 = vpop.f32.mrb[4].mxu0  ;;  %1337 = vpow2.f32 %v1083_v15 }
 0x970   :  { %v1260_v17 = vpop.f32.mrb[5].mxu0  ;;  %v969_v24 = vadd.f32 %v1833_v26, %v968_v16 }
 0x971   :  { %v971_v18 = vpop.f32.mrb[6].mxu0 }
 0x972   :  { %v1261_v19 = vpop.f32.mrb[7].mxu0 }
 0x978   :  { %v1336_v20 = vpop.eup %1335 }
 0x979   :  { %v978_v21 = vadd.f32 1.0, %v1336_v20  ;;  %v1338_v22 = vpop.eup %1337 }
 0x97a   :  { %v985_v23 = vadd.f32 1.0, %v1338_v22 }
 0x97b   :  { %1339 = vrcp.f32 %v978_v21 }
 0x97c   :  { %1341 = vrcp.f32 %v985_v23 }
 0x985   :  { %v1340_v25 = vpop.eup %1339 }
 0x986   :  { %v988_v28 = vmul.f32 %v1340_v25, %v969_v24  ;;  %v1342_v32 = vpop.eup %1341 }
 0x987   :  { %v991_v33 = vsub.f32 1.0, %v1342_v32  ;;  %v993_v37 = vmul.f32 %v1527_v45, %v1342_v32 }
 0x988   :  { %v989_v30 = vadd.f32 %v988_v28, %v812_v27 }
 0x98a   :  { %1343 = vtanh.f32 %v989_v30 }
 0x994   :  { %v1344_v34 = vpop.eup %1343 }
 0x995   :  { %v992_v36 = vmul.f32 %v1344_v34, %v991_v33 }
 0x997   :  { %v994_v57 = vadd.f32 %v993_v37, %v992_v36 }
 0x999   :  { %995 = vst.msk [vmem:[#allocation14] sm:$0xff] %vm215_vm1, %v994_v57 }
 0x99a   :  { %1466 = shalt.err (!%p1463_p5)
}
 0x99b   :  { %s1467_s6 = scalar_lea.hbm %s2112_s15, 1024 }
 0x99c   :  { %p1468_p6 = scmp.ne.s32.totalorder %s2112_s15, %s1467_s6  ;;  %p1471_p7 = scmp.lt.u32.totalorder %s1467_s6, %s2112_s15 }
 0x99e   :  { %p1473_p8 = pnand %p1471_p7, %p1468_p6 }
 0x9a0   :  { %1476 = shalt.err (!%p1473_p8)
}
 0x9a1   :  { %1007 = dma.vmem_to_hbm [thread:$0]  %s1002_s24, 1024, %s2112_s15, [#allocation4], %s1530_s1, %s1530_s1, %s1531_s16  }
 0x9a2   :  { %1507 = dma.done.wait [#allocation4], 1024  }
 0x9a3   :  { %1508 = vsyncadd [#allocation4], 4294966272 }
 0x9a4   :  { %1011 = vsyncpa [#allocation3], 1 }
 0x9a5   :  { %1012 = vsyncpa [#allocation10], 1 }
 0x9a6   :  { %1013 = vsyncpa [#allocation13], 1 }
 0x9a7   :  { %1014 = vsyncpa [#allocation4], 1 }
 0x9a8   :  { %1015 = vsyncpa [#allocation5], 1 }
 0x9a9   :  { %1016 = vsyncpa [#allocation6], 1 }

</bundles_post_ra>
